<compile_context>
chip_gen: v5e
topology: v5e:2x2
jax: 0.10.0
libtpu: 0.0.40
codegen_flags: <defaults>
</compile_context>

<pallas_src>
import functools
import math

import jax
import jax.numpy as jnp
from jax.experimental import pallas as pl
from jax.experimental.pallas import tpu as pltpu


def _round_up(x, m):
    return ((x + m - 1) // m) * m


# ----------------------------------------------------------------------------
# Generic linear (x @ W + b) kernel, row-tiled.
# ----------------------------------------------------------------------------
def _linear_kernel(x_ref, w_ref, b_ref, o_ref):
    # x_ref: (tm, K)  w_ref: (K, N)  b_ref: (1, N)  o_ref: (tm, N)
    y = jnp.dot(x_ref[...], w_ref[...], preferred_element_type=jnp.float32)
    o_ref[...] = (y + b_ref[...].astype(jnp.float32)).astype(o_ref.dtype)


def linear(x2, w, b, *, tm_max=512):
    """x2: (M, K) -> (M, N), computing x2 @ w + b.  w: (K, N), b: (N,)."""
    M, K = x2.shape
    N = w.shape[1]

    # Large, 8-aligned row tile; pad M instead of asserting divisibility.
    tm = min(tm_max, _round_up(M, 8))
    M_pad = _round_up(M, tm)
    if M_pad != M:
        x2 = jnp.pad(x2, ((0, M_pad - M), (0, 0)))

    itemsize = jnp.dtype(x2.dtype).itemsize
    out = pl.pallas_call(
        _linear_kernel,
        out_shape=jax.ShapeDtypeStruct((M_pad, N), x2.dtype),
        grid_spec=pltpu.PrefetchScalarGridSpec(
            num_scalar_prefetch=0,
            grid=(M_pad // tm,),
            in_specs=[
                pl.BlockSpec((tm, K), lambda i: (i, 0)),   # x tile (pipelined)
                pl.BlockSpec((K, N), lambda i: (0, 0)),    # W (VMEM-resident)
                pl.BlockSpec((1, N), lambda i: (0, 0)),    # b (VMEM-resident)
            ],
            out_specs=pl.BlockSpec((tm, N), lambda i: (i, 0)),
        ),
        compiler_params=pltpu.CompilerParams(
            dimension_semantics=("parallel",),
        ),
        cost_estimate=pl.CostEstimate(
            flops=2 * M_pad * K * N,
            transcendentals=0,
            bytes_accessed=(M_pad * K + K * N + N + M_pad * N) * itemsize,
        ),
    )(x2, w, b.reshape(1, N))
    return out[:M]


# ----------------------------------------------------------------------------
# Scale-dot-product attention over a group of (batch*head) slices per step.
# ----------------------------------------------------------------------------
def _attn_kernel(q_ref, k_ref, v_ref, o_ref, *, scale):
    # q_ref: (G, Lq, d)   k_ref/v_ref: (G, Lk, d)   o_ref: (G, Lq, d)
    q = q_ref[...].astype(jnp.float32)
    k = k_ref[...].astype(jnp.float32)
    v = v_ref[...]

    # score = q @ k^T / sqrt(d)   (batched over the head-group axis, on MXU)
    s = jnp.einsum("gqd,gkd->gqk", q, k,
                   preferred_element_type=jnp.float32) * scale
    # numerically stable softmax over the key axis
    s = s - jnp.max(s, axis=-1, keepdims=True)
    p = jnp.exp(s)
    p = p / jnp.sum(p, axis=-1, keepdims=True)

    o = jnp.einsum("gqk,gkd->gqd", p.astype(v.dtype), v,
                   preferred_element_type=jnp.float32)
    o_ref[...] = o.astype(o_ref.dtype)


def scaled_dot_product_attention(q, k, v, *, g_max=16):
    """q: (B, H, Lq, d), k/v: (B, H, Lk, d) -> (B, H, Lq, d)."""
    B, H, Lq, d = q.shape
    Lk = k.shape[2]
    BH = B * H

    qf = q.reshape(BH, Lq, d)
    kf = k.reshape(BH, Lk, d)
    vf = v.reshape(BH, Lk, d)

    # Group several (batch, head) slices per grid step to amortize the
    # ~0.35 us per-grid-step overhead.
    G = min(g_max, BH)
    BH_pad = _round_up(BH, G)
    if BH_pad != BH:
        pad = BH_pad - BH
        qf = jnp.pad(qf, ((0, pad), (0, 0), (0, 0)))
        kf = jnp.pad(kf, ((0, pad), (0, 0), (0, 0)))
        vf = jnp.pad(vf, ((0, pad), (0, 0), (0, 0)))

    scale = 1.0 / math.sqrt(d)
    itemsize = jnp.dtype(q.dtype).itemsize
    out = pl.pallas_call(
        functools.partial(_attn_kernel, scale=scale),
        out_shape=jax.ShapeDtypeStruct((BH_pad, Lq, d), q.dtype),
        grid_spec=pltpu.PrefetchScalarGridSpec(
            num_scalar_prefetch=0,
            grid=(BH_pad // G,),
            in_specs=[
                pl.BlockSpec((G, Lq, d), lambda i: (i, 0, 0)),
                pl.BlockSpec((G, Lk, d), lambda i: (i, 0, 0)),
                pl.BlockSpec((G, Lk, d), lambda i: (i, 0, 0)),
            ],
            out_specs=pl.BlockSpec((G, Lq, d), lambda i: (i, 0, 0)),
        ),
        compiler_params=pltpu.CompilerParams(
            dimension_semantics=("parallel",),
        ),
        cost_estimate=pl.CostEstimate(
            flops=4 * BH_pad * Lq * Lk * d,
            transcendentals=BH_pad * Lq * Lk,
            bytes_accessed=(BH_pad * (Lq * d + 2 * Lk * d + Lq * d)) * itemsize,
        ),
    )(qf, kf, vf)
    return out[:BH].reshape(B, H, Lq, d)


# ----------------------------------------------------------------------------
# Full MultiHeadAttention forward.
# ----------------------------------------------------------------------------
def multi_head_attention(q, k, v, params, *, n_head, mask=None):
    """q: (B, Lq, D), k/v: (B, Lk, D). params holds (in,out)-layout weights."""
    # TODO(synk): mask (masked_fill(mask == 0, -10000)) path not implemented.
    assert mask is None, "mask is not supported by this Pallas kernel"

    B, Lq, D = q.shape
    Lk = k.shape[1]
    d = D // n_head

    # Projections (each a row-tiled Pallas matmul).
    qp = linear(q.reshape(-1, D), params["wq"], params["bq"]).reshape(B, Lq, D)
    kp = linear(k.reshape(-1, D), params["wk"], params["bk"]).reshape(B, Lk, D)
    vp = linear(v.reshape(-1, D), params["wv"], params["bv"]).reshape(B, Lk, D)

    # split: (B, L, D) -> (B, H, L, d)   [layout plumbing in the wrapper]
    qh = qp.reshape(B, Lq, n_head, d).transpose(0, 2, 1, 3)
    kh = kp.reshape(B, Lk, n_head, d).transpose(0, 2, 1, 3)
    vh = vp.reshape(B, Lk, n_head, d).transpose(0, 2, 1, 3)

    oh = scaled_dot_product_attention(qh, kh, vh)

    # concat: (B, H, Lq, d) -> (B, Lq, D)
    oc = oh.transpose(0, 2, 1, 3).reshape(B, Lq, D)

    # output projection
    out = linear(oc.reshape(-1, D), params["wo"], params["bo"]).reshape(B, Lq, D)
    return out


# ----------------------------------------------------------------------------
# Helpers: PyTorch-style nn.Linear init (weights stored as W^T = (in, out)).
# ----------------------------------------------------------------------------
def _init_linear(key, in_features, out_features, dtype=jnp.float32):
    kw, kb = jax.random.split(key)
    bound = 1.0 / (in_features ** 0.5)
    w_t = jax.random.uniform(kw, (in_features, out_features), dtype,
                             minval=-bound, maxval=bound)
    b = jax.random.uniform(kb, (out_features,), dtype, minval=-bound, maxval=bound)
    return w_t, b


def _reference_mha(q, k, v, p, n_head):
    """Pure-JAX reference of the PyTorch forward (mask=None)."""
    B, Lq, D = q.shape
    Lk = k.shape[1]
    d = D // n_head
    qp = q @ p["wq"] + p["bq"]
    kp = k @ p["wk"] + p["bk"]
    vp = v @ p["wv"] + p["bv"]
    qh = qp.reshape(B, Lq, n_head, d).transpose(0, 2, 1, 3)
    kh = kp.reshape(B, Lk, n_head, d).transpose(0, 2, 1, 3)
    vh = vp.reshape(B, Lk, n_head, d).transpose(0, 2, 1, 3)
    s = jnp.einsum("bhqd,bhkd->bhqk", qh, kh) / math.sqrt(d)
    a = jax.nn.softmax(s, axis=-1)
    oh = jnp.einsum("bhqk,bhkd->bhqd", a, vh)
    oc = oh.transpose(0, 2, 1, 3).reshape(B, Lq, D)
    return oc @ p["wo"] + p["bo"]


if __name__ == "__main__":
    hidden_size = 32   # D
    n_head = 4
    batch, seq = 2, 8

    key = jax.random.PRNGKey(0)
    kq, kk, kv, k1, k2, k3, k4 = jax.random.split(key, 7)

    q = jax.random.normal(kq, (batch, seq, hidden_size), jnp.float32)
    k = jax.random.normal(kk, (batch, seq, hidden_size), jnp.float32)
    v = jax.random.normal(kv, (batch, seq, hidden_size), jnp.float32)

    wq, bq = _init_linear(k1, hidden_size, hidden_size)
    wk, bk = _init_linear(k2, hidden_size, hidden_size)
    wv, bv = _init_linear(k3, hidden_size, hidden_size)
    wo, bo = _init_linear(k4, hidden_size, hidden_size)
    params = dict(wq=wq, bq=bq, wk=wk, bk=bk, wv=wv, bv=bv, wo=wo, bo=bo)

    fwd = jax.jit(functools.partial(multi_head_attention, n_head=n_head))
    out = fwd(q, k, v, params)
    out = jax.block_until_ready(out)

    ref = _reference_mha(q, k, v, params, n_head)
    assert out.shape == (batch, seq, hidden_size)
    assert jnp.allclose(out, ref, atol=1e-4, rtol=1e-4), "mismatch vs reference"

    print("KERNEL_OK")
</pallas_src>

<mosaic_0001>
module attributes {stable_mosaic.version = 11 : i64} {
  func.func @_linear_kernel(%arg0: i32, %arg1: memref<16x32xf32, #tpu.memory_space<vmem>>, %arg2: memref<32x32xf32, #tpu.memory_space<vmem>>, %arg3: memref<1x32xf32, #tpu.memory_space<vmem>>, %arg4: memref<16x32xf32, #tpu.memory_space<vmem>>) attributes {dimension_semantics = [#tpu.dimension_semantics<parallel>], iteration_bounds = array<i64: 1>, scalar_prefetch = 0 : i64, scratch_operands = 0 : i64, tpu.core_type = #tpu.core_type<tc>, window_params = [{transform_indices = @transform_0, window_bounds = array<i64: 16, 32>}, {pipeline_mode = #tpu.pipeline_mode<synchronous>, transform_indices = @transform_1, window_bounds = array<i64: 32, 32>}, {pipeline_mode = #tpu.pipeline_mode<synchronous>, transform_indices = @transform_2, window_bounds = array<i64: 1, 32>}, {transform_indices = @transform_3, window_bounds = array<i64: 16, 32>}]} {
    %c0 = arith.constant 0 : index
    %c0_0 = arith.constant 0 : index
    %0 = vector.load %arg1[%c0, %c0_0] : memref<16x32xf32, #tpu.memory_space<vmem>>, vector<16x32xf32>
    %c0_1 = arith.constant 0 : index
    %c0_2 = arith.constant 0 : index
    %1 = vector.load %arg2[%c0_1, %c0_2] : memref<32x32xf32, #tpu.memory_space<vmem>>, vector<32x32xf32>
    %cst = arith.constant dense<0.000000e+00> : vector<16x32xf32>
    %2 = tpu.matmul %0, %1, %cst {dimension_numbers = #tpu.dot_dimension_numbers<[1], [0], [0], [1], [0, 0, 1, 1], [], []>} : vector<16x32xf32>, vector<32x32xf32>, vector<16x32xf32> -> vector<16x32xf32>
    %c0_3 = arith.constant 0 : index
    %c0_4 = arith.constant 0 : index
    %3 = vector.load %arg3[%c0_3, %c0_4] : memref<1x32xf32, #tpu.memory_space<vmem>>, vector<1x32xf32>
    %4 = vector.broadcast %3 : vector<1x32xf32> to vector<16x32xf32>
    %5 = arith.addf %2, %4 : vector<16x32xf32>
    %c0_5 = arith.constant 0 : index
    %c0_6 = arith.constant 0 : index
    %6 = vector.load %arg4[%c0_5, %c0_6] : memref<16x32xf32, #tpu.memory_space<vmem>>, vector<16x32xf32>
    tpu.vector_store %arg4[%c0_5, %c0_6], %5 {strides = array<i32>} : memref<16x32xf32, #tpu.memory_space<vmem>>, vector<16x32xf32>,
    return
  }
  func.func @transform_0(%arg0: i32) -> (i32, i32) {
    %c0_i32 = arith.constant 0 : i32
    %c0_i32_0 = arith.constant 0 : i32
    return %arg0, %c0_i32 : i32, i32
  }
  func.func @transform_1(%arg0: i32) -> (i32, i32) {
    %c0_i32 = arith.constant 0 : i32
    %c0_i32_0 = arith.constant 0 : i32
    %c0_i32_1 = arith.constant 0 : i32
    return %c0_i32, %c0_i32_0 : i32, i32
  }
  func.func @transform_2(%arg0: i32) -> (i32, i32) {
    %c0_i32 = arith.constant 0 : i32
    %c0_i32_0 = arith.constant 0 : i32
    %c0_i32_1 = arith.constant 0 : i32
    return %c0_i32, %c0_i32_0 : i32, i32
  }
  func.func @transform_3(%arg0: i32) -> (i32, i32) {
    %c0_i32 = arith.constant 0 : i32
    %c0_i32_0 = arith.constant 0 : i32
    return %arg0, %c0_i32 : i32, i32
  }
}

module attributes {stable_mosaic.version = 11 : i64} {
  func.func @_linear_kernel(%arg0: i32, %arg1: memref<16x32xf32, #tpu.memory_space<vmem>>, %arg2: memref<32x32xf32, #tpu.memory_space<vmem>>, %arg3: memref<1x32xf32, #tpu.memory_space<vmem>>, %arg4: memref<16x32xf32, #tpu.memory_space<vmem>>) attributes {dimension_semantics = [#tpu.dimension_semantics<parallel>], iteration_bounds = array<i64: 1>, scalar_prefetch = 0 : i64, scratch_operands = 0 : i64, tpu.core_type = #tpu.core_type<tc>, window_params = [{transform_indices = @transform_0, window_bounds = array<i64: 16, 32>}, {pipeline_mode = #tpu.pipeline_mode<synchronous>, transform_indices = @transform_1, window_bounds = array<i64: 32, 32>}, {pipeline_mode = #tpu.pipeline_mode<synchronous>, transform_indices = @transform_2, window_bounds = array<i64: 1, 32>}, {transform_indices = @transform_3, window_bounds = array<i64: 16, 32>}]} {
    %c0 = arith.constant 0 : index
    %c0_0 = arith.constant 0 : index
    %0 = vector.load %arg1[%c0, %c0_0] : memref<16x32xf32, #tpu.memory_space<vmem>>, vector<16x32xf32>
    %c0_1 = arith.constant 0 : index
    %c0_2 = arith.constant 0 : index
    %1 = vector.load %arg2[%c0_1, %c0_2] : memref<32x32xf32, #tpu.memory_space<vmem>>, vector<32x32xf32>
    %cst = arith.constant dense<0.000000e+00> : vector<16x32xf32>
    %2 = tpu.matmul %0, %1, %cst {dimension_numbers = #tpu.dot_dimension_numbers<[1], [0], [0], [1], [0, 0, 1, 1], [], []>} : vector<16x32xf32>, vector<32x32xf32>, vector<16x32xf32> -> vector<16x32xf32>
    %c0_3 = arith.constant 0 : index
    %c0_4 = arith.constant 0 : index
    %3 = vector.load %arg3[%c0_3, %c0_4] : memref<1x32xf32, #tpu.memory_space<vmem>>, vector<1x32xf32>
    %4 = vector.broadcast %3 : vector<1x32xf32> to vector<16x32xf32>
    %5 = arith.addf %2, %4 : vector<16x32xf32>
    %c0_5 = arith.constant 0 : index
    %c0_6 = arith.constant 0 : index
    %6 = vector.load %arg4[%c0_5, %c0_6] : memref<16x32xf32, #tpu.memory_space<vmem>>, vector<16x32xf32>
    tpu.vector_store %arg4[%c0_5, %c0_6], %5 {strides = array<i32>} : memref<16x32xf32, #tpu.memory_space<vmem>>, vector<16x32xf32>,
    return
  }
  func.func @transform_0(%arg0: i32) -> (i32, i32) {
    %c0_i32 = arith.constant 0 : i32
    %c0_i32_0 = arith.constant 0 : i32
    return %arg0, %c0_i32 : i32, i32
  }
  func.func @transform_1(%arg0: i32) -> (i32, i32) {
    %c0_i32 = arith.constant 0 : i32
    %c0_i32_0 = arith.constant 0 : i32
    %c0_i32_1 = arith.constant 0 : i32
    return %c0_i32, %c0_i32_0 : i32, i32
  }
  func.func @transform_2(%arg0: i32) -> (i32, i32) {
    %c0_i32 = arith.constant 0 : i32
    %c0_i32_0 = arith.constant 0 : i32
    %c0_i32_1 = arith.constant 0 : i32
    return %c0_i32, %c0_i32_0 : i32, i32
  }
  func.func @transform_3(%arg0: i32) -> (i32, i32) {
    %c0_i32 = arith.constant 0 : i32
    %c0_i32_0 = arith.constant 0 : i32
    return %arg0, %c0_i32 : i32, i32
  }
}

module attributes {stable_mosaic.version = 11 : i64} {
  func.func @_attn_kernel(%arg0: i32, %arg1: memref<8x8x8xf32, #tpu.memory_space<vmem>>, %arg2: memref<8x8x8xf32, #tpu.memory_space<vmem>>, %arg3: memref<8x8x8xf32, #tpu.memory_space<vmem>>, %arg4: memref<8x8x8xf32, #tpu.memory_space<vmem>>) attributes {dimension_semantics = [#tpu.dimension_semantics<parallel>], iteration_bounds = array<i64: 1>, scalar_prefetch = 0 : i64, scratch_operands = 0 : i64, tpu.core_type = #tpu.core_type<tc>, window_params = [{transform_indices = @transform_0, window_bounds = array<i64: 8, 8, 8>}, {transform_indices = @transform_1, window_bounds = array<i64: 8, 8, 8>}, {transform_indices = @transform_2, window_bounds = array<i64: 8, 8, 8>}, {transform_indices = @transform_3, window_bounds = array<i64: 8, 8, 8>}]} {
    %c0 = arith.constant 0 : index
    %c0_0 = arith.constant 0 : index
    %c0_1 = arith.constant 0 : index
    %0 = vector.load %arg1[%c0, %c0_0, %c0_1] : memref<8x8x8xf32, #tpu.memory_space<vmem>>, vector<8x8x8xf32>
    %c0_2 = arith.constant 0 : index
    %c0_3 = arith.constant 0 : index
    %c0_4 = arith.constant 0 : index
    %1 = vector.load %arg2[%c0_2, %c0_3, %c0_4] : memref<8x8x8xf32, #tpu.memory_space<vmem>>, vector<8x8x8xf32>
    %c0_5 = arith.constant 0 : index
    %c0_6 = arith.constant 0 : index
    %c0_7 = arith.constant 0 : index
    %2 = vector.load %arg3[%c0_5, %c0_6, %c0_7] : memref<8x8x8xf32, #tpu.memory_space<vmem>>, vector<8x8x8xf32>
    "tpu.trace_start"() <{level = 10 : i32, message = "gqd,gkd->gqk"}> : () -> ()
    %cst = arith.constant dense<0.000000e+00> : vector<8x8x8xf32>
    %3 = tpu.matmul %0, %1, %cst {dimension_numbers = #tpu.dot_dimension_numbers<[2], [2], [1], [1], [0, 0, 0, 1, 1, 1], [0], [0]>} : vector<8x8x8xf32>, vector<8x8x8xf32>, vector<8x8x8xf32> -> vector<8x8x8xf32>
    "tpu.trace_stop"() : () -> ()
    %cst_8 = arith.constant 0.353553385 : f32
    %4 = vector.broadcast %cst_8 : f32 to vector<8x8x8xf32>
    %5 = arith.mulf %3, %4 : vector<8x8x8xf32>
    %cst_9 = arith.constant dense<0xFF800000> : vector<8x8xf32>
    %6 = vector.multi_reduction <maximumf>, %5, %cst_9 [2] : vector<8x8x8xf32> to vector<8x8xf32>
    %7 = vector.shape_cast %6 : vector<8x8xf32> to vector<8x8x1xf32>
    %8 = vector.broadcast %7 : vector<8x8x1xf32> to vector<8x8x8xf32>
    %9 = arith.subf %5, %8 : vector<8x8x8xf32>
    %10 = math.exp %9 : vector<8x8x8xf32>
    %cst_10 = arith.constant dense<0.000000e+00> : vector<8x8xf32>
    %11 = vector.multi_reduction <add>, %10, %cst_10 [2] : vector<8x8x8xf32> to vector<8x8xf32>
    %12 = vector.shape_cast %11 : vector<8x8xf32> to vector<8x8x1xf32>
    %13 = vector.broadcast %12 : vector<8x8x1xf32> to vector<8x8x8xf32>
    %14 = arith.divf %10, %13 : vector<8x8x8xf32>
    "tpu.trace_start"() <{level = 10 : i32, message = "gqk,gkd->gqd"}> : () -> ()
    %cst_11 = arith.constant dense<0.000000e+00> : vector<8x8x8xf32>
    %15 = tpu.matmul %14, %2, %cst_11 {dimension_numbers = #tpu.dot_dimension_numbers<[2], [1], [1], [2], [0, 0, 0, 1, 1, 2], [0], [0]>} : vector<8x8x8xf32>, vector<8x8x8xf32>, vector<8x8x8xf32> -> vector<8x8x8xf32>
    "tpu.trace_stop"() : () -> ()
    %c0_12 = arith.constant 0 : index
    %c0_13 = arith.constant 0 : index
    %c0_14 = arith.constant 0 : index
    %16 = vector.load %arg4[%c0_12, %c0_13, %c0_14] : memref<8x8x8xf32, #tpu.memory_space<vmem>>, vector<8x8x8xf32>
    tpu.vector_store %arg4[%c0_12, %c0_13, %c0_14], %15 {strides = array<i32>} : memref<8x8x8xf32, #tpu.memory_space<vmem>>, vector<8x8x8xf32>,
    return
  }
  func.func @transform_0(%arg0: i32) -> (i32, i32, i32) {
    %c0_i32 = arith.constant 0 : i32
    %c0_i32_0 = arith.constant 0 : i32
    %c0_i32_1 = arith.constant 0 : i32
    return %arg0, %c0_i32, %c0_i32_0 : i32, i32, i32
  }
  func.func @transform_1(%arg0: i32) -> (i32, i32, i32) {
    %c0_i32 = arith.constant 0 : i32
    %c0_i32_0 = arith.constant 0 : i32
    %c0_i32_1 = arith.constant 0 : i32
    return %arg0, %c0_i32, %c0_i32_0 : i32, i32, i32
  }
  func.func @transform_2(%arg0: i32) -> (i32, i32, i32) {
    %c0_i32 = arith.constant 0 : i32
    %c0_i32_0 = arith.constant 0 : i32
    %c0_i32_1 = arith.constant 0 : i32
    return %arg0, %c0_i32, %c0_i32_0 : i32, i32, i32
  }
  func.func @transform_3(%arg0: i32) -> (i32, i32, i32) {
    %c0_i32 = arith.constant 0 : i32
    %c0_i32_0 = arith.constant 0 : i32
    %c0_i32_1 = arith.constant 0 : i32
    return %arg0, %c0_i32, %c0_i32_0 : i32, i32, i32
  }
}

module attributes {stable_mosaic.version = 11 : i64} {
  func.func @_linear_kernel(%arg0: i32, %arg1: memref<16x32xf32, #tpu.memory_space<vmem>>, %arg2: memref<32x32xf32, #tpu.memory_space<vmem>>, %arg3: memref<1x32xf32, #tpu.memory_space<vmem>>, %arg4: memref<16x32xf32, #tpu.memory_space<vmem>>) attributes {dimension_semantics = [#tpu.dimension_semantics<parallel>], iteration_bounds = array<i64: 1>, scalar_prefetch = 0 : i64, scratch_operands = 0 : i64, tpu.core_type = #tpu.core_type<tc>, window_params = [{transform_indices = @transform_0, window_bounds = array<i64: 16, 32>}, {pipeline_mode = #tpu.pipeline_mode<synchronous>, transform_indices = @transform_1, window_bounds = array<i64: 32, 32>}, {pipeline_mode = #tpu.pipeline_mode<synchronous>, transform_indices = @transform_2, window_bounds = array<i64: 1, 32>}, {transform_indices = @transform_3, window_bounds = array<i64: 16, 32>}]} {
    %c0 = arith.constant 0 : index
    %c0_0 = arith.constant 0 : index
    %0 = vector.load %arg1[%c0, %c0_0] : memref<16x32xf32, #tpu.memory_space<vmem>>, vector<16x32xf32>
    %c0_1 = arith.constant 0 : index
    %c0_2 = arith.constant 0 : index
    %1 = vector.load %arg2[%c0_1, %c0_2] : memref<32x32xf32, #tpu.memory_space<vmem>>, vector<32x32xf32>
    %cst = arith.constant dense<0.000000e+00> : vector<16x32xf32>
    %2 = tpu.matmul %0, %1, %cst {dimension_numbers = #tpu.dot_dimension_numbers<[1], [0], [0], [1], [0, 0, 1, 1], [], []>} : vector<16x32xf32>, vector<32x32xf32>, vector<16x32xf32> -> vector<16x32xf32>
    %c0_3 = arith.constant 0 : index
    %c0_4 = arith.constant 0 : index
    %3 = vector.load %arg3[%c0_3, %c0_4] : memref<1x32xf32, #tpu.memory_space<vmem>>, vector<1x32xf32>
    %4 = vector.broadcast %3 : vector<1x32xf32> to vector<16x32xf32>
    %5 = arith.addf %2, %4 : vector<16x32xf32>
    %c0_5 = arith.constant 0 : index
    %c0_6 = arith.constant 0 : index
    %6 = vector.load %arg4[%c0_5, %c0_6] : memref<16x32xf32, #tpu.memory_space<vmem>>, vector<16x32xf32>
    tpu.vector_store %arg4[%c0_5, %c0_6], %5 {strides = array<i32>} : memref<16x32xf32, #tpu.memory_space<vmem>>, vector<16x32xf32>,
    return
  }
  func.func @transform_0(%arg0: i32) -> (i32, i32) {
    %c0_i32 = arith.constant 0 : i32
    %c0_i32_0 = arith.constant 0 : i32
    return %arg0, %c0_i32 : i32, i32
  }
  func.func @transform_1(%arg0: i32) -> (i32, i32) {
    %c0_i32 = arith.constant 0 : i32
    %c0_i32_0 = arith.constant 0 : i32
    %c0_i32_1 = arith.constant 0 : i32
    return %c0_i32, %c0_i32_0 : i32, i32
  }
  func.func @transform_2(%arg0: i32) -> (i32, i32) {
    %c0_i32 = arith.constant 0 : i32
    %c0_i32_0 = arith.constant 0 : i32
    %c0_i32_1 = arith.constant 0 : i32
    return %c0_i32, %c0_i32_0 : i32, i32
  }
  func.func @transform_3(%arg0: i32) -> (i32, i32) {
    %c0_i32 = arith.constant 0 : i32
    %c0_i32_0 = arith.constant 0 : i32
    return %arg0, %c0_i32 : i32, i32
  }
}

</mosaic_0001>

<bundles_post_ra>
// kernel: multi_head_attention.5
= control target key start
LH: loop header
LB: loop body
LE: loop exit
PB: predicated region body
PF: predicated region fallthrough
CT: control target
= control target key end

     0   :  { %8 = vsyncpa [#allocation3], 0  ;;  %s235_s0 = inlined_call_operand.hbm [shape: f32[16,32], index: 0, kind: input, shape index: {}]   ;;  %s236_s1 = inlined_call_operand.hbm [shape: f32[32,32], index: 1, kind: input, shape index: {}]   ;;  %s237_s2 = inlined_call_operand.hbm [shape: f32[1,32], index: 2, kind: input, shape index: {}]   ;;  %s238_s3 = inlined_call_operand.vmem [shape: f32[16,32], index: 3, kind: output, shape index: {}]  }
   0x1   :  { %9 = vsyncpa [#allocation5], 0  ;;  %s27_s14 = sshll.u32 %s236_s1, 4  ;;  %s195_s15 = smov [#allocation4]   ;;  %s28_s14 = int_to_ptr.hbm [resolvable:$true] %s27_s14 }
   0x2   :  { %s29_s16 = sshll.u32 %s195_s15, 4  ;;  %s14_s19 = sshll.u32 %s235_s0, 4  ;;  %s30_s16 = int_to_ptr.vmem [resolvable:$true] %s29_s16  ;;  %s15_s19 = int_to_ptr.hbm [resolvable:$true] %s14_s19 }
   0x3   :  { %s196_s20 = smov 128   ;;  %s197_s21 = smov 8  }
   0x4   :  { %35 = dma.hbm_to_vmem [thread:$0]  %s28_s14, 512, %s30_s16, [#allocation5], %s196_s20, %s196_s20, %s197_s21  }
   0x5   :  { %s198_s22 = smov [#allocation2]   ;;  %s41_s26 = sshll.u32 %s237_s2, 4  ;;  %s42_s26 = int_to_ptr.hbm [resolvable:$true] %s41_s26 }
   0x6   :  { %s16_s23 = sshll.u32 %s198_s22, 4  ;;  %s199_s1 = smov [#allocation6]   ;;  %s17_s23 = int_to_ptr.vmem [resolvable:$true] %s16_s23 }
   0x7   :  { %22 = dma.hbm_to_vmem [thread:$0]  %s15_s19, 256, %s17_s23, [#allocation3], %s196_s20, %s196_s20, %s197_s21  }
   0x8   :  { %s43_s27 = sshll.u32 %s199_s1, 4  ;;  %s44_s27 = int_to_ptr.vmem [resolvable:$true] %s43_s27 }
   0x9   :  { %46 = dma.hbm_to_vmem [thread:$0]  %s42_s26, 16, %s44_s27, [#allocation5]  }
   0xa   :  { %191 = dma.done.wait [#allocation3], 256  }
   0xb   :  { %192 = vsyncadd [#allocation3], 4294967040 }
   0xc   :  { %193 = dma.done.wait [#allocation5], 528  }
   0xd   :  { %194 = vsyncadd [#allocation5], 4294966768  ;;  %v64_v0 = vld [vmem:[#allocation4 + $0x18] sm:$0xff]  ;;  %v63_v1 = vld [vmem:[#allocation4 + $0x10] sm:$0xff]  ;;  %vm69_vm0 = vcmask 261120  }
   0xe   :  { %88 = vmatpush.msra.mxu0 %v64_v0  ;;  %109 = vmatpush.msra.mxu1 %v64_v0  ;;  %v62_v2 = vld [vmem:[#allocation4 + $0x8] sm:$0xff]  ;;  %v61_v3 = vld [vmem:[#allocation4] sm:$0xff]  ;;  %v59_v4 = vld [vmem:[#allocation2] sm:$0xff] }
   0xf   :  { %v60_v5 = vld [vmem:[#allocation2 + $0x8] sm:$0xff]  ;;  %v118_v6 = vld [vmem:[#allocation6] ss:$0 sm:$0xff] }
  0x10   :  { %89 = vmatpush.msra.mxu0 %v63_v1  ;;  %110 = vmatpush.msra.mxu1 %v63_v1 }
  0x12   :  { %90 = vmatpush.msra.mxu0 %v62_v2  ;;  %111 = vmatpush.msra.mxu1 %v62_v2 }
  0x14   :  { %91 = vmatpush.msra.mxu0 %v61_v3  ;;  %112 = vmatpush.msra.mxu1 %v61_v3 }
  0x15   :  { %107 = vmatmul.msk.f32.vlgmr.msra.gmra.mxu0 %vm69_vm0, %v59_v4  ;;  %108 = vmatmul.msk.f32.vlgmr.msra.gmra.mxu1 %vm69_vm0, %v60_v5 }
  0x92   :  { %v93_v7 = vpop.f32.mrf.mxu0  ;;  %v96_v8 = vpop.f32.mrf.mxu1 }
  0x93   :  { %v94_v9 = vadd.f32 %v118_v6, %v93_v7  ;;  %v97_v10 = vadd.f32 %v118_v6, %v96_v8 }
  0x95   :  { %99 = vst.msk [vmem:[%s238_s3] sm:$0xff] %vm69_vm0, %v94_v9 }
  0x96   :  { %100 = vst.msk [vmem:[%s238_s3 + $0x8] sm:$0xff] %vm69_vm0, %v97_v10 }
  0x97   :  { %105 = vsyncpa [#allocation3], 1 }
  0x98   :  { %106 = vsyncpa [#allocation5], 1 }

// kernel: multi_head_attention.7
= control target key start
LH: loop header
LB: loop body
LE: loop exit
PB: predicated region body
PF: predicated region fallthrough
CT: control target
= control target key end

     0   :  { %8 = vsyncpa [#allocation3], 0  ;;  %s109_s15 = smov [#allocation2]   ;;  %s157_s0 = inlined_call_operand.vmem [shape: f32[16,32], index: 0, kind: input, shape index: {}]   ;;  %s158_s1 = inlined_call_operand.vmem [shape: f32[32,32], index: 1, kind: input, shape index: {}]   ;;  %s159_s2 = inlined_call_operand.hbm [shape: f32[1,32], index: 2, kind: input, shape index: {}]   ;;  %s160_s3 = inlined_call_operand.vmem [shape: f32[16,32], index: 3, kind: output, shape index: {}]  }
   0x1   :  { %s18_s14 = sshll.u32 %s159_s2, 4  ;;  %s20_s16 = sshll.u32 %s109_s15, 4  ;;  %s19_s14 = int_to_ptr.hbm [resolvable:$true] %s18_s14  ;;  %s21_s16 = int_to_ptr.vmem [resolvable:$true] %s20_s16 }
   0x2   :  { %23 = dma.hbm_to_vmem [thread:$0]  %s19_s14, 16, %s21_s16, [#allocation3]  }
   0x3   :  { %107 = dma.done.wait [#allocation3], 16  }
   0x4   :  { %108 = vsyncadd [#allocation3], 4294967280  ;;  %v33_v0 = vld [vmem:[%s158_s1 + $0x18] sm:$0xff]  ;;  %v32_v1 = vld [vmem:[%s158_s1 + $0x10] sm:$0xff]  ;;  %vm38_vm0 = vcmask 261120  }
   0x5   :  { %57 = vmatpush.msra.mxu0 %v33_v0  ;;  %77 = vmatpush.msra.mxu1 %v33_v0  ;;  %v31_v2 = vld [vmem:[%s158_s1 + $0x8] sm:$0xff]  ;;  %v30_v3 = vld [vmem:[%s158_s1] sm:$0xff] }
   0x6   :  { %v28_v4 = vld [vmem:[%s157_s0] sm:$0xff]  ;;  %v29_v5 = vld [vmem:[%s157_s0 + $0x8] sm:$0xff] }
   0x7   :  { %58 = vmatpush.msra.mxu0 %v32_v1  ;;  %78 = vmatpush.msra.mxu1 %v32_v1  ;;  %v82_v6 = vld [vmem:[#allocation2] ss:$0 sm:$0xff] }
   0x9   :  { %59 = vmatpush.msra.mxu0 %v31_v2  ;;  %79 = vmatpush.msra.mxu1 %v31_v2 }
   0xb   :  { %60 = vmatpush.msra.mxu0 %v30_v3  ;;  %80 = vmatpush.msra.mxu1 %v30_v3 }
   0xc   :  { %75 = vmatmul.msk.f32.vlgmr.msra.gmra.mxu0 %vm38_vm0, %v28_v4  ;;  %76 = vmatmul.msk.f32.vlgmr.msra.gmra.mxu1 %vm38_vm0, %v29_v5 }
  0x89   :  { %v62_v7 = vpop.f32.mrf.mxu0  ;;  %v65_v8 = vpop.f32.mrf.mxu1 }
  0x8a   :  { %v63_v9 = vadd.f32 %v82_v6, %v62_v7  ;;  %v66_v10 = vadd.f32 %v82_v6, %v65_v8 }
  0x8c   :  { %68 = vst.msk [vmem:[%s160_s3] sm:$0xff] %vm38_vm0, %v63_v9 }
  0x8d   :  { %69 = vst.msk [vmem:[%s160_s3 + $0x8] sm:$0xff] %vm38_vm0, %v66_v10 }
  0x8e   :  { %74 = vsyncpa [#allocation3], 1 }

// kernel: multi_head_attention.9
= control target key start
LH: loop header
LB: loop body
LE: loop exit
PB: predicated region body
PF: predicated region fallthrough
CT: control target
= control target key end

     0   :  { %s162_s0 = inlined_call_operand.vmem [shape: f32[16,32], index: 0, kind: input, shape index: {}]   ;;  %s163_s1 = inlined_call_operand.vmem [shape: f32[32,32], index: 1, kind: input, shape index: {}]   ;;  %s164_s2 = inlined_call_operand.vmem [shape: f32[1,32], index: 2, kind: input, shape index: {}]   ;;  %s165_s3 = inlined_call_operand.hbm [shape: f32[16,32], index: 3, kind: output, shape index: {}]  }
   0x1   :  { %v20_v0 = vld [vmem:[%s163_s1 + $0x18] sm:$0xff]  ;;  %v19_v1 = vld [vmem:[%s163_s1 + $0x10] sm:$0xff]  ;;  %v18_v2 = vld [vmem:[%s163_s1 + $0x8] sm:$0xff] }
   0x2   :  { %44 = vmatpush.msra.mxu0 %v20_v0  ;;  %77 = vmatpush.msra.mxu1 %v20_v0 }
   0x3   :  { %8 = vsyncpa [#allocation3], 0  ;;  %v17_v3 = vld [vmem:[%s163_s1] sm:$0xff]  ;;  %vm25_vm0 = vcmask 261120   ;;  %v16_v5 = vld [vmem:[%s162_s0 + $0x8] sm:$0xff]  ;;  %s111_s1 = smov [#allocation2]  }
   0x4   :  { %45 = vmatpush.msra.mxu0 %v19_v1  ;;  %78 = vmatpush.msra.mxu1 %v19_v1  ;;  %v15_v4 = vld [vmem:[%s162_s0] sm:$0xff]  ;;  %s61_s26 = sshll.u32 %s111_s1, 4  ;;  %s63_s29 = sshll.u32 %s165_s3, 4  ;;  %s62_s26 = int_to_ptr.vmem [resolvable:$true] %s61_s26  ;;  %s64_s29 = int_to_ptr.hbm [resolvable:$true] %s63_s29 }
   0x5   :  { %v84_v6 = vld [vmem:[%s164_s2] ss:$0 sm:$0xff]  ;;  %s112_s0 = smov 128   ;;  %s113_s30 = smov 8  }
   0x6   :  { %46 = vmatpush.msra.mxu0 %v18_v2  ;;  %79 = vmatpush.msra.mxu1 %v18_v2 }
   0x8   :  { %47 = vmatpush.msra.mxu0 %v17_v3  ;;  %80 = vmatpush.msra.mxu1 %v17_v3 }
   0x9   :  { %75 = vmatmul.msk.f32.vlgmr.msra.gmra.mxu0 %vm25_vm0, %v15_v4  ;;  %76 = vmatmul.msk.f32.vlgmr.msra.gmra.mxu1 %vm25_vm0, %v16_v5 }
  0x86   :  { %v49_v7 = vpop.f32.mrf.mxu0  ;;  %v52_v8 = vpop.f32.mrf.mxu1 }
  0x87   :  { %v50_v9 = vadd.f32 %v84_v6, %v49_v7  ;;  %v53_v10 = vadd.f32 %v84_v6, %v52_v8 }
  0x89   :  { %55 = vst.msk [vmem:[#allocation2] sm:$0xff] %vm25_vm0, %v50_v9 }
  0x8a   :  { %56 = vst.msk [vmem:[#allocation2 + $0x8] sm:$0xff] %vm25_vm0, %v53_v10 }
  0x8b   :  { %69 = dma.vmem_to_hbm [thread:$0]  %s62_s26, 256, %s64_s29, [#allocation3], %s112_s0, %s112_s0, %s113_s30  }
  0x8c   :  { %109 = dma.done.wait [#allocation3], 256  }
  0x8d   :  { %110 = vsyncadd [#allocation3], 4294967040 }
  0x8e   :  { %74 = vsyncpa [#allocation3], 1 }

// kernel: multi_head_attention.8
= control target key start
LH: loop header
LB: loop body
LE: loop exit
PB: predicated region body
PF: predicated region fallthrough
CT: control target
= control target key end

     0   :  { %vm38_vm0 = vcmask 64512   ;;  %s940_s1 = inlined_call_operand.vmem [shape: f32[8,8,8], index: 1, kind: input, shape index: {}]   ;;  %s941_s0 = inlined_call_operand.vmem [shape: f32[8,8,8], index: 0, kind: input, shape index: {}]   ;;  %s942_s2 = inlined_call_operand.vmem [shape: f32[8,8,8], index: 2, kind: input, shape index: {}]   ;;  %s943_s3 = inlined_call_operand.vmem [shape: f32[8,8,8], index: 3, kind: output, shape index: {}]  }
   0x1   :  { %v22_v0 = vld [vmem:[%s940_s1] sm:$0xff]  ;;  %v24_v1 = vld [vmem:[%s940_s1 + $0x10] sm:$0xff]  ;;  %v23_v5 = vld [vmem:[%s940_s1 + $0x8] sm:$0xff] }
   0x2   :  { %v14_v2 = vld [vmem:[%s941_s0] sm:$0xff]  ;;  %643 = vmatpush.xpose.msk.msra.mxu0 %vm38_vm0, %v22_v0  ;;  %647 = vmatpush.xpose.msk.msra.mxu2 %vm38_vm0, %v24_v1  ;;  %v16_v3 = vld [vmem:[%s941_s0 + $0x10] sm:$0xff]  ;;  %v25_v6 = vld [vmem:[%s940_s1 + $0x18] sm:$0xff] }
   0x3   :  { %v28_v4 = vld [vmem:[%s940_s1 + $0x30] sm:$0xff]  ;;  %645 = vmatpush.xpose.msk.msra.mxu1 %vm38_vm0, %v23_v5  ;;  %v15_v7 = vld [vmem:[%s941_s0 + $0x8] sm:$0xff]  ;;  %649 = vmatpush.xpose.msk.msra.mxu3 %vm38_vm0, %v25_v6  ;;  %v17_v8 = vld [vmem:[%s941_s0 + $0x18] sm:$0xff] }
   0x4   :  { %v29_v9 = vld [vmem:[%s940_s1 + $0x38] sm:$0xff]  ;;  %v27_v10 = vld [vmem:[%s940_s1 + $0x28] sm:$0xff]  ;;  %v26_v11 = vld [vmem:[%s940_s1 + $0x20] sm:$0xff] }
   0x5   :  { %644 = vmatmul.msk.f32.vlgmr.msra.gmra.mxu0 %vm38_vm0, %v14_v2  ;;  %648 = vmatmul.msk.f32.vlgmr.msra.gmra.mxu2 %vm38_vm0, %v16_v3  ;;  %v20_v12 = vld [vmem:[%s941_s0 + $0x30] sm:$0xff]  ;;  %v18_v13 = vld [vmem:[%s941_s0 + $0x20] sm:$0xff]  ;;  %v19_v14 = vld [vmem:[%s941_s0 + $0x28] sm:$0xff] }
   0x6   :  { %655 = vmatpush.xpose.msk.msrb.mxu2 %vm38_vm0, %v28_v4  ;;  %646 = vmatmul.msk.f32.vlgmr.msra.gmra.mxu1 %vm38_vm0, %v15_v7  ;;  %v21_v15 = vld [vmem:[%s941_s0 + $0x38] sm:$0xff] }
   0x7   :  { %657 = vmatpush.xpose.msk.msrb.mxu3 %vm38_vm0, %v29_v9  ;;  %653 = vmatpush.xpose.msk.msrb.mxu1 %vm38_vm0, %v27_v10 }
   0x8   :  { %650 = vmatmul.msk.f32.vlgmr.msra.gmra.mxu3 %vm38_vm0, %v17_v8  ;;  %651 = vmatpush.xpose.msk.msrb.mxu0 %vm38_vm0, %v26_v11 }
   0xd   :  { %656 = vmatmul.msk.f32.vlgmr.msrb.gmra.mxu2 %vm38_vm0, %v20_v12  ;;  %652 = vmatmul.msk.f32.vlgmr.msrb.gmra.mxu0 %vm38_vm0, %v18_v13 }
   0xe   :  { %654 = vmatmul.msk.f32.vlgmr.msrb.gmra.mxu1 %vm38_vm0, %v19_v14 }
  0x10   :  { %658 = vmatmul.msk.f32.vlgmr.msrb.gmra.mxu3 %vm38_vm0, %v21_v15 }
  0x82   :  { %v62_v16 = vpop.f32.mrf.mxu0 }
  0x83   :  { %v247_v17 = vmul.f32 0.35355338, %v62_v16  ;;  %v88_v18 = vpop.f32.mrf.mxu1  ;;  %v30_v16 = vld [vmem:[%s942_s2] sm:$0xff] }
  0x84   :  { %v248_v20 = vmul.f32 0.35355338, %v88_v18  ;;  %465 = vmatpush.msra.mxu0 %v30_v16 }
  0x85   :  { %v255_v19 = vsel %vm38_vm0, %v247_v17, -inf }
  0x86   :  { %256 = vmax.xlane.f32.xlu1 %v255_v19  ;;  %v258_v25 = vsel %vm38_vm0, %v248_v20, -inf }
  0x88   :  { %v114_v21 = vpop.f32.mrf.mxu2 }
  0x89   :  { %v249_v22 = vmul.f32 0.35355338, %v114_v21  ;;  %v31_v21 = vld [vmem:[%s942_s2 + $0x8] sm:$0xff] }
  0x8a   :  { %v166_v32 = vpop.f32.mrf.mxu0  ;;  %488 = vmatpush.msra.mxu1 %v31_v21 }
  0x8b   :  { %v140_v23 = vpop.f32.mrf.mxu3  ;;  %v261_v24 = vsel %vm38_vm0, %v249_v22, -inf  ;;  %v192_v26 = vpop.f32.mrf.mxu1  ;;  %v251_v36 = vmul.f32 0.35355338, %v166_v32 }
  0x8c   :  { %262 = vmax.xlane.f32.xlu0 %v261_v24  ;;  %v250_v27 = vmul.f32 0.35355338, %v140_v23  ;;  %v252_v28 = vmul.f32 0.35355338, %v192_v26 }
  0x8d   :  { %v267_v39 = vsel %vm38_vm0, %v251_v36, -inf }
  0x8e   :  { %259 = vmax.xlane.f32.xlu1 %v258_v25  ;;  %v264_v31 = vsel %vm38_vm0, %v250_v27, -inf  ;;  %v270_v35 = vsel %vm38_vm0, %v252_v28, -inf }
  0x90   :  { %v218_v29 = vpop.f32.mrf.mxu2 }
  0x91   :  { %v253_v30 = vmul.f32 0.35355338, %v218_v29 }
  0x93   :  { %v244_v33 = vpop.f32.mrf.mxu3  ;;  %v273_v34 = vsel %vm38_vm0, %v253_v30, -inf }
  0x94   :  { %265 = vmax.xlane.f32.xlu0 %v264_v31  ;;  %274 = vmax.xlane.f32.xlu2 %v273_v34  ;;  %v254_v37 = vmul.f32 0.35355338, %v244_v33  ;;  %v36_v33 = vld [vmem:[%s942_s2 + $0x30] sm:$0xff]  ;;  %v37_v34 = vld [vmem:[%s942_s2 + $0x38] sm:$0xff] }
  0x96   :  { %271 = vmax.xlane.f32.xlu1 %v270_v35  ;;  %v276_v38 = vsel %vm38_vm0, %v254_v37, -inf  ;;  %v34_v35 = vld [vmem:[%s942_s2 + $0x20] sm:$0xff] }
  0x97   :  { %557 = vmatpush.msrb.mxu0 %v34_v35 }
  0x9c   :  { %277 = vmax.xlane.f32.xlu2 %v276_v38  ;;  %268 = vmax.xlane.f32.xlu0 %v267_v39  ;;  %v35_v39 = vld [vmem:[%s942_s2 + $0x28] sm:$0xff] }
  0x9d   :  { %580 = vmatpush.msrb.mxu1 %v35_v39 }
  0xf9   :  { %v257_v40 = vpop.xlane.xlu1 %256 }
  0xfa   :  { %v279_v41 = vsub.f32 %v247_v17, %v257_v40  ;;  %v32_v17 = vld [vmem:[%s942_s2 + $0x10] sm:$0xff] }
  0xfb   :  { %511 = vmatpush.msra.mxu2 %v32_v17 }
  0xfc   :  { %v287_v42 = vmul.f32 1.442695, %v279_v41 }
  0xfd   :  { %603 = vmatpush.msrb.mxu2 %v36_v33 }
  0xfe   :  { %667 = vpow2.f32 %v287_v42 }
  0xff   :  { %v263_v43 = vpop.xlane.xlu0 %262 }
 0x100   :  { %v281_v44 = vsub.f32 %v249_v22, %v263_v43 }
 0x101   :  { %v260_v45 = vpop.xlane.xlu1 %259 }
 0x102   :  { %v291_v46 = vmul.f32 1.442695, %v281_v44  ;;  %v280_v47 = vsub.f32 %v248_v20, %v260_v45  ;;  %v33_v20 = vld [vmem:[%s942_s2 + $0x18] sm:$0xff] }
 0x103   :  { %534 = vmatpush.msra.mxu3 %v33_v20 }
 0x104   :  { %v791_v48 = vpop.eup %667  ;;  %669 = vpow2.f32 %v291_v46  ;;  %v289_v50 = vmul.f32 1.442695, %v280_v47 }
 0x105   :  { %v303_v49 = vsel %vm38_vm0, %v791_v48, 0.0  ;;  %626 = vmatpush.msrb.mxu3 %v37_v34 }
 0x106   :  { %304 = vadd.xlane.f32.xlu1 %v303_v49  ;;  %671 = vpow2.f32 %v289_v50 }
 0x107   :  { %v266_v51 = vpop.xlane.xlu0 %265  ;;  %v275_v52 = vpop.xlane.xlu2 %274 }
 0x108   :  { %v282_v53 = vsub.f32 %v250_v27, %v266_v51  ;;  %v285_v56 = vsub.f32 %v253_v30, %v275_v52 }
 0x109   :  { %v272_v59 = vpop.xlane.xlu1 %271 }
 0x10a   :  { %v795_v54 = vpop.eup %669  ;;  %v293_v55 = vmul.f32 1.442695, %v282_v53  ;;  %v299_v58 = vmul.f32 1.442695, %v285_v56  ;;  %v284_v2 = vsub.f32 %v252_v28, %v272_v59 }
 0x10b   :  { %v309_v57 = vsel %vm38_vm0, %v795_v54, 0.0 }
 0x10c   :  { %673 = vpow2.f32 %v293_v55  ;;  %310 = vadd.xlane.f32.xlu2 %v309_v57  ;;  %v799_v62 = vpop.eup %671  ;;  %v297_v7 = vmul.f32 1.442695, %v284_v2 }
 0x10d   :  { %675 = vpow2.f32 %v299_v58  ;;  %v306_v5 = vsel %vm38_vm0, %v799_v62, 0.0 }
 0x10f   :  { %v278_v60 = vpop.xlane.xlu2 %277  ;;  %v269_v61 = vpop.xlane.xlu0 %268 }
 0x110   :  { %v286_v63 = vsub.f32 %v254_v37, %v278_v60  ;;  %v283_v0 = vsub.f32 %v251_v36, %v269_v61 }
 0x112   :  { %v801_v1 = vpop.eup %673  ;;  %v301_v3 = vmul.f32 1.442695, %v286_v63  ;;  %v295_v4 = vmul.f32 1.442695, %v283_v0 }
 0x113   :  { %v312_v6 = vsel %vm38_vm0, %v801_v1, 0.0  ;;  %v807_v8 = vpop.eup %675 }
 0x114   :  { %677 = vpow2.f32 %v301_v3  ;;  %307 = vadd.xlane.f32.xlu2 %v306_v5  ;;  %313 = vadd.xlane.f32.xlu0 %v312_v6  ;;  %v321_v12 = vsel %vm38_vm0, %v807_v8, 0.0 }
 0x115   :  { %679 = vpow2.f32 %v295_v4 }
 0x116   :  { %681 = vpow2.f32 %v297_v7 }
 0x11a   :  { %v809_v9 = vpop.eup %677 }
 0x11b   :  { %v811_v10 = vpop.eup %679  ;;  %v324_v11 = vsel %vm38_vm0, %v809_v9, 0.0 }
 0x11c   :  { %325 = vadd.xlane.f32.xlu1 %v324_v11  ;;  %322 = vadd.xlane.f32.xlu0 %v321_v12  ;;  %v315_v13 = vsel %vm38_vm0, %v811_v10, 0.0  ;;  %v819_v14 = vpop.eup %681 }
 0x11d   :  { %316 = vadd.xlane.f32.xlu2 %v315_v13  ;;  %v318_v15 = vsel %vm38_vm0, %v819_v14, 0.0 }
 0x124   :  { %319 = vadd.xlane.f32.xlu0 %v318_v15 }
 0x179   :  { %v305_v18 = vpop.xlane.xlu1 %304 }
 0x17a   :  { %683 = vrcp.f32 %v305_v18  ;;  %v338_v25 = vand.u32 2147483648, %v305_v18  ;;  %v336_v27 = vand.u32 2147483647, %v305_v18  ;;  %vm332_vm2 = vweird.f32 %v305_v18 }
 0x17c   :  { %v339_v36 = vor.u32 1.1754944e-38, %v338_v25  ;;  %vm337_vm4 = vcmp.eq.f32.partialorder %v336_v27, 8.507059e+37 }
 0x17f   :  { %v311_v19 = vpop.xlane.xlu2 %310 }
 0x180   :  { %v684_v22 = vpop.eup %683  ;;  %685 = vrcp.f32 %v311_v19  ;;  %v366_v44 = vand.u32 2147483647, %v311_v19  ;;  %v368_v45 = vand.u32 2147483648, %v311_v19  ;;  %vm362_vm6 = vweird.f32 %v311_v19 }
 0x181   :  { %v328_v23 = vmul.f32 %v684_v22, %v305_v18  ;;  %vm333_vm1 = vweird.f32 %v684_v22 }
 0x182   :  { %vm334_vm3 = vmor %vm332_vm2, %vm333_vm1  ;;  %vm367_vm8 = vcmp.eq.f32.partialorder %v366_v44, 8.507059e+37  ;;  %v369_v56 = vor.u32 1.1754944e-38, %v368_v45 }
 0x183   :  { %v329_v24 = vsub.f32 1.0, %v328_v23 }
 0x185   :  { %v330_v26 = vmul.f32 %v684_v22, %v329_v24 }
 0x186   :  { %v686_v28 = vpop.eup %685 }
 0x187   :  { %v331_v29 = vadd.f32 %v684_v22, %v330_v26  ;;  %v358_v30 = vmul.f32 %v686_v28, %v311_v19  ;;  %v308_v31 = vpop.xlane.xlu2 %307  ;;  %v314_v32 = vpop.xlane.xlu0 %313  ;;  %vm363_vm5 = vweird.f32 %v686_v28 }
 0x188   :  { %687 = vrcp.f32 %v308_v31  ;;  %vm849_vm7 = vmor %vm362_vm6, %vm363_vm5  ;;  %v351_v58 = vand.u32 2147483647, %v308_v31  ;;  %v353_v59 = vand.u32 2147483648, %v308_v31  ;;  %v381_v61 = vand.u32 2147483647, %v314_v32 }
 0x189   :  { %v335_v37 = vsel %vm334_vm3, %v684_v22, %v331_v29  ;;  %v359_v38 = vsub.f32 1.0, %v358_v30  ;;  %689 = vrcp.f32 %v314_v32  ;;  %v383_v2 = vand.u32 2147483648, %v314_v32 }
 0x18a   :  { %v340_v40 = vsel %vm337_vm4, %v339_v36, %v335_v37  ;;  %vm347_vm11 = vweird.f32 %v308_v31  ;;  %vm377_vm12 = vweird.f32 %v314_v32  ;;  %vm352_vm14 = vcmp.eq.f32.partialorder %v351_v58, 8.507059e+37 }
 0x18b   :  { %v360_v41 = vmul.f32 %v686_v28, %v359_v38  ;;  %v341_v42 = vmul.f32 %v791_v48, %v340_v40  ;;  %v354_v6 = vor.u32 1.1754944e-38, %v353_v59  ;;  %vm382_vm1 = vcmp.eq.f32.partialorder %v381_v61, 8.507059e+37 }
 0x18c   :  { %v384_v13 = vor.u32 1.1754944e-38, %v383_v2 }
 0x18d   :  { %v361_v43 = vadd.f32 %v686_v28, %v360_v41  ;;  %659 = vmatmul.msk.f32.vlgmr.msra.gmra.mxu0 %vm38_vm0, %v341_v42 }
 0x18e   :  { %v688_v46 = vpop.eup %687 }
 0x18f   :  { %v690_v47 = vpop.eup %689  ;;  %v343_v50 = vmul.f32 %v688_v46, %v308_v31  ;;  %v853_v51 = vpop.xlane.xlu1 %325  ;;  %v365_v48 = vsel %vm849_vm7, %v686_v28, %v361_v43  ;;  %vm348_vm9 = vweird.f32 %v688_v46 }
 0x190   :  { %v855_v52 = vpop.xlane.xlu0 %322  ;;  %v373_v53 = vmul.f32 %v690_v47, %v314_v32  ;;  %691 = vrcp.f32 %v853_v51  ;;  %v860_v55 = vpop.xlane.xlu2 %316  ;;  %v370_v63 = vsel %vm367_vm8, %v369_v56, %v365_v48  ;;  %vm378_vm10 = vweird.f32 %v690_v47  ;;  %vm349_vm13 = vmor %vm347_vm11, %vm348_vm9 }
 0x191   :  { %v344_v57 = vsub.f32 1.0, %v343_v50  ;;  %693 = vrcp.f32 %v860_v55  ;;  %v371_v11 = vmul.f32 %v795_v54, %v370_v63  ;;  %vm379_vm15 = vmor %vm377_vm12, %vm378_vm10  ;;  %vm437_vm2 = vweird.f32 %v853_v51 }
 0x192   :  { %v374_v60 = vsub.f32 1.0, %v373_v53  ;;  %695 = vrcp.f32 %v855_v52  ;;  %v441_v54 = vand.u32 2147483647, %v853_v51  ;;  %v443_v24 = vand.u32 2147483648, %v853_v51 }
 0x193   :  { %v345_v0 = vmul.f32 %v688_v46, %v344_v57  ;;  %661 = vmatmul.msk.f32.vlgmr.msra.gmra.mxu2 %vm38_vm0, %v371_v11  ;;  %vm392_vm3 = vweird.f32 %v860_v55  ;;  %v396_v25 = vand.u32 2147483647, %v860_v55  ;;  %v398_v30 = vand.u32 2147483648, %v860_v55 }
 0x194   :  { %v375_v3 = vmul.f32 %v690_v47, %v374_v60  ;;  %v426_v31 = vand.u32 2147483647, %v855_v52  ;;  %v428_v32 = vand.u32 2147483648, %v855_v52  ;;  %vm442_vm7 = vcmp.eq.f32.partialorder %v441_v54, 8.507059e+37 }
 0x195   :  { %v346_v4 = vadd.f32 %v688_v46, %v345_v0  ;;  %v444_v37 = vor.u32 1.1754944e-38, %v443_v24  ;;  %vm885_vm8 = vcmp.eq.f32.partialorder %v396_v25, 8.507059e+37  ;;  %v399_v43 = vor.u32 1.1754944e-38, %v398_v30 }
 0x196   :  { %v692_v5 = vpop.eup %691  ;;  %v376_v7 = vadd.f32 %v690_v47, %v375_v3  ;;  %vm422_vm11 = vweird.f32 %v855_v52  ;;  %vm427_vm12 = vcmp.eq.f32.partialorder %v426_v31, 8.507059e+37 }
 0x197   :  { %v350_v12 = vsel %vm349_vm13, %v688_v46, %v346_v4  ;;  %v433_v15 = vmul.f32 %v692_v5, %v853_v51  ;;  %v694_v17 = vpop.eup %693  ;;  %vm438_vm4 = vweird.f32 %v692_v5  ;;  %v429_v46 = vor.u32 1.1754944e-38, %v428_v32 }
 0x198   :  { %v866_v16 = vpop.xlane.xlu0 %319  ;;  %v355_v18 = vsel %vm352_vm14, %v354_v6, %v350_v12  ;;  %v380_v19 = vsel %vm379_vm15, %v690_v47, %v376_v7  ;;  %v388_v22 = vmul.f32 %v694_v17, %v860_v55  ;;  %v696_v23 = vpop.eup %695  ;;  %vm393_vm5 = vweird.f32 %v694_v17  ;;  %vm439_vm6 = vmor %vm437_vm2, %vm438_vm4 }
 0x199   :  { %697 = vrcp.f32 %v866_v16  ;;  %v385_v20 = vsel %vm382_vm1, %v384_v13, %v380_v19  ;;  %v434_v21 = vsub.f32 1.0, %v433_v15  ;;  %v356_v26 = vmul.f32 %v799_v62, %v355_v18  ;;  %vm394_vm10 = vmor %vm392_vm3, %vm393_vm5 }
 0x19a   :  { %v389_v28 = vsub.f32 1.0, %v388_v22  ;;  %v418_v29 = vmul.f32 %v696_v23, %v855_v52  ;;  %v386_v33 = vmul.f32 %v801_v1, %v385_v20  ;;  %vm423_vm9 = vweird.f32 %v696_v23 }
 0x19b   :  { %v435_v27 = vmul.f32 %v692_v5, %v434_v21  ;;  %660 = vmatmul.msk.f32.vlgmr.msra.gmra.mxu1 %vm38_vm0, %v356_v26  ;;  %vm424_vm13 = vmor %vm422_vm11, %vm423_vm9  ;;  %v411_v51 = vand.u32 2147483647, %v866_v16  ;;  %v413_v48 = vand.u32 2147483648, %v866_v16  ;;  %vm407_vm15 = vweird.f32 %v866_v16 }
 0x19c   :  { %v390_v35 = vmul.f32 %v694_v17, %v389_v28  ;;  %v419_v36 = vsub.f32 1.0, %v418_v29  ;;  %662 = vmatmul.msk.f32.vlgmr.msra.gmra.mxu3 %vm38_vm0, %v386_v33 }
 0x19d   :  { %v436_v34 = vadd.f32 %v692_v5, %v435_v27  ;;  %v414_v58 = vor.u32 1.1754944e-38, %v413_v48  ;;  %vm412_vm2 = vcmp.eq.f32.partialorder %v411_v51, 8.507059e+37 }
 0x19e   :  { %v391_v40 = vadd.f32 %v694_v17, %v390_v35  ;;  %v420_v1 = vmul.f32 %v696_v23, %v419_v36 }
 0x19f   :  { %v698_v62 = vpop.eup %697  ;;  %v440_v39 = vsel %vm439_vm6, %v692_v5, %v436_v34 }
 0x1a0   :  { %v403_v41 = vmul.f32 %v698_v62, %v866_v16  ;;  %v445_v42 = vsel %vm442_vm7, %v444_v37, %v440_v39  ;;  %v395_v44 = vsel %vm394_vm10, %v694_v17, %v391_v40  ;;  %v421_v45 = vadd.f32 %v696_v23, %v420_v1 }
 0x1a1   :  { %v446_v49 = vmul.f32 %v809_v9, %v445_v42  ;;  %v400_v50 = vsel %vm885_vm8, %v399_v43, %v395_v44  ;;  %vm408_vm14 = vweird.f32 %v698_v62 }
 0x1a2   :  { %v404_v47 = vsub.f32 1.0, %v403_v41  ;;  %v401_v53 = vmul.f32 %v811_v10, %v400_v50  ;;  %v425_v55 = vsel %vm424_vm13, %v696_v23, %v421_v45  ;;  %vm409_vm1 = vmor %vm407_vm15, %vm408_vm14 }
 0x1a3   :  { %v430_v56 = vsel %vm427_vm12, %v429_v46, %v425_v55 }
 0x1a4   :  { %v405_v52 = vmul.f32 %v698_v62, %v404_v47  ;;  %663 = vmatmul.msk.f32.vlgmr.msrb.gmra.mxu0 %vm38_vm0, %v401_v53  ;;  %v431_v9 = vmul.f32 %v807_v8, %v430_v56  ;;  %666 = vmatmul.msk.f32.vlgmr.msrb.gmra.mxu3 %vm38_vm0, %v446_v49 }
 0x1a6   :  { %v406_v57 = vadd.f32 %v698_v62, %v405_v52  ;;  %665 = vmatmul.msk.f32.vlgmr.msrb.gmra.mxu2 %vm38_vm0, %v431_v9 }
 0x1a8   :  { %v410_v59 = vsel %vm409_vm1, %v698_v62, %v406_v57 }
 0x1a9   :  { %v415_v10 = vsel %vm412_vm2, %v414_v58, %v410_v59 }
 0x1aa   :  { %v416_v60 = vmul.f32 %v819_v14, %v415_v10 }
 0x1ac   :  { %664 = vmatmul.msk.f32.vlgmr.msrb.gmra.mxu1 %vm38_vm0, %v416_v60 }
 0x20a   :  { %v467_v61 = vpop.f32.mrf.mxu0 }
 0x20b   :  { %631 = vst.msk [vmem:[%s943_s3] sm:$0xff] %vm38_vm0, %v467_v61 }
 0x216   :  { %v513_v63 = vpop.f32.mrf.mxu2 }
 0x217   :  { %633 = vst.msk [vmem:[%s943_s3 + $0x10] sm:$0xff] %vm38_vm0, %v513_v63 }
 0x218   :  { %v490_v8 = vpop.f32.mrf.mxu1 }
 0x219   :  { %632 = vst.msk [vmem:[%s943_s3 + $0x8] sm:$0xff] %vm38_vm0, %v490_v8 }
 0x21f   :  { %v536_v14 = vpop.f32.mrf.mxu3 }
 0x220   :  { %634 = vst.msk [vmem:[%s943_s3 + $0x18] sm:$0xff] %vm38_vm0, %v536_v14 }
 0x221   :  { %v559_v0 = vpop.f32.mrf.mxu0 }
 0x222   :  { %635 = vst.msk [vmem:[%s943_s3 + $0x20] sm:$0xff] %vm38_vm0, %v559_v0 }
 0x227   :  { %v628_v3 = vpop.f32.mrf.mxu3 }
 0x228   :  { %638 = vst.msk [vmem:[%s943_s3 + $0x38] sm:$0xff] %vm38_vm0, %v628_v3 }
 0x229   :  { %v582_v2 = vpop.f32.mrf.mxu1  ;;  %v605_v4 = vpop.f32.mrf.mxu2 }
 0x22a   :  { %636 = vst.msk [vmem:[%s943_s3 + $0x28] sm:$0xff] %vm38_vm0, %v582_v2 }
 0x22b   :  { %637 = vst.msk [vmem:[%s943_s3 + $0x30] sm:$0xff] %vm38_vm0, %v605_v4 }

</bundles_post_ra>
